<compile_context>
chip_gen: v7x
topology: tpu7x:2x2x1
jax: 0.10.0
libtpu: 0.0.40
codegen_flags: <defaults>
</compile_context>

<pallas_src>
import jax
import jax.numpy as jnp
from jax.experimental import pallas as pl
from jax.experimental.pallas import tpu as pltpu


# ----------------------------- Pallas kernel -----------------------------
def _dueling_kernel(
    x_ref,      # state tile, feature-major: (S, TILE_B)
    a_ref,      # action tile, feature-major: (A, TILE_B)
    w1_ref,     # shared layer 1 weight (H1, S)
    b1_ref,     # shared layer 1 bias   (H1, 1)
    w2_ref,     # shared layer 2 weight (E, H1)
    b2_ref,     # shared layer 2 bias   (E, 1)
    wq_ref,     # folded value+adv state weight (1, E)
    waa_ref,    # adv action weight             (1, A)
    bq_ref,     # folded bias                   (1, 1)
    q_ref,      # output tile (1, TILE_B)
):
    x = x_ref[...]                       # (S, TB)
    a = a_ref[...]                       # (A, TB)

    # shared_network: Linear + ReLU, Linear + ReLU  (feature-major)
    h1 = jnp.dot(w1_ref[...], x, preferred_element_type=jnp.float32) + b1_ref[...]
    h1 = jnp.maximum(h1, 0.0)            # (H1, TB)
    emb = jnp.dot(w2_ref[...], h1, preferred_element_type=jnp.float32) + b2_ref[...]
    emb = jnp.maximum(emb, 0.0)          # (E, TB)

    # q = value + advantage, with the value head folded into the state part of the
    # advantage head (wq = wv + was, bq = bv + ba) — mathematically identical.
    q = (jnp.dot(wq_ref[...], emb, preferred_element_type=jnp.float32)
         + jnp.dot(waa_ref[...], a, preferred_element_type=jnp.float32)
         + bq_ref[...])                  # (1, TB)

    q_ref[...] = q.astype(q_ref.dtype)


# ------------------------------ wrapper -----------------------------------
def parametric_dueling_q(state, action, params, *, tile_b=512):
    """state: (B, S) f32, action: (B, A) f32 -> q_value: (B, 1) f32."""
    w1, b1, w2, b2, wv, bv, was, waa, ba = params
    B, S = state.shape
    A = action.shape[1]
    H1 = w1.shape[1]
    E = w2.shape[1]

    # --- wrapper-side precompute (layout plumbing + linear head fold, done once) ---
    w1t = w1.T                    # (H1, S)
    b1t = b1.T                    # (H1, 1)
    w2t = w2.T                    # (E, H1)
    b2t = b2.T                    # (E, 1)
    wq = (wv + was).T             # (1, E)   value head folded into advantage head
    waa_t = waa.T                 # (1, A)
    bq = bv + ba                  # (1, 1)

    # Feature-major activations: batch on the lane axis.
    state_t = state.T             # (S, B)
    action_t = action.T           # (A, B)

    # Pad batch up to a multiple of TILE_B so every tile is full and stores unmasked.
    pad = (-B) % tile_b
    if pad:
        state_t = jnp.pad(state_t, ((0, 0), (0, pad)))
        action_t = jnp.pad(action_t, ((0, 0), (0, pad)))
    Bp = B + pad
    grid = (Bp // tile_b,)

    cost = pl.CostEstimate(
        flops=2 * Bp * (S * H1 + H1 * E + E + A),
        transcendentals=0,
        bytes_accessed=4 * (Bp * (S + A + 1) + S * H1 + H1 * E + H1 + 2 * E + A + 1),
    )

    q_t = pl.pallas_call(
        _dueling_kernel,
        out_shape=jax.ShapeDtypeStruct((1, Bp), jnp.float32),
        grid=grid,
        in_specs=[
            # streamed per grid step
            pl.BlockSpec((S, tile_b), lambda i: (0, i)),
            pl.BlockSpec((A, tile_b), lambda i: (0, i)),
            # weights: constant index_map -> stay VMEM-resident across the grid
            pl.BlockSpec((H1, S), lambda i: (0, 0)),
            pl.BlockSpec((H1, 1), lambda i: (0, 0)),
            pl.BlockSpec((E, H1), lambda i: (0, 0)),
            pl.BlockSpec((E, 1), lambda i: (0, 0)),
            pl.BlockSpec((1, E), lambda i: (0, 0)),
            pl.BlockSpec((1, A), lambda i: (0, 0)),
            pl.BlockSpec((1, 1), lambda i: (0, 0)),
        ],
        out_specs=pl.BlockSpec((1, tile_b), lambda i: (0, i)),
        compiler_params=pltpu.CompilerParams(
            dimension_semantics=("parallel",),   # megacore sharding on v7x
        ),
        cost_estimate=cost,
    )(state_t, action_t, w1t, b1t, w2t, b2t, wq, waa_t, bq)

    return q_t[:, :B].T           # back to (B, 1)


# ------------------------- deterministic params --------------------------
def init_params(key, state_dim, action_dim, layers):
    """layers = [h1, emb] like ReAgent's make_fully_connected(layers=...).
    Weights stored as (in_features, out_features), biases as (1, out_features)."""
    h1, emb = layers
    shapes = [
        ("w1", (state_dim, h1)), ("b1", (1, h1)),
        ("w2", (h1, emb)),       ("b2", (1, emb)),
        ("wv", (emb, 1)),        ("bv", (1, 1)),
        ("was", (emb, 1)),       ("waa", (action_dim, 1)), ("ba", (1, 1)),
    ]
    keys = jax.random.split(key, len(shapes))
    params = []
    for k, (name, shp) in zip(keys, shapes):
        fan_in = shp[0] if not name.startswith("b") else shp[1]
        scale = 1.0 / jnp.sqrt(jnp.float32(max(fan_in, 1)))
        params.append(scale * jax.random.normal(k, shp, dtype=jnp.float32))
    return params


# ----------------------------- pure-JAX ref -------------------------------
def reference(state, action, params):
    w1, b1, w2, b2, wv, bv, was, waa, ba = params
    h1 = jnp.maximum(state @ w1 + b1, 0.0)
    emb = jnp.maximum(h1 @ w2 + b2, 0.0)
    value = emb @ wv + bv
    sa = jnp.concatenate([emb, action], axis=1)
    wa = jnp.concatenate([was, waa], axis=0)
    adv = sa @ wa + ba
    return value + adv


if __name__ == "__main__":
    STATE_DIM, ACTION_DIM = 8, 4
    LAYERS = [16, 8]  # hidden, state_embedding_dim
    TILE_B = 512

    root = jax.random.PRNGKey(0)
    k_state, k_action, k_params, k_state2, k_action2 = jax.random.split(root, 5)
    params = init_params(k_params, STATE_DIM, ACTION_DIM, LAYERS)

    # Case 1: small batch consistent with the module spec (single padded tile).
    B1 = 2
    state1 = jax.random.normal(k_state, (B1, STATE_DIM), dtype=jnp.float32)
    action1 = jax.random.normal(k_action, (B1, ACTION_DIM), dtype=jnp.float32)
    q1 = jax.block_until_ready(parametric_dueling_q(state1, action1, params, tile_b=TILE_B))
    q1_ref = reference(state1, action1, params)
    assert q1.shape == (B1, 1), q1.shape
    assert jnp.allclose(q1, q1_ref, atol=1e-4, rtol=1e-4), (q1, q1_ref)

    # Case 2: larger ragged batch exercising the multi-step grid + tail padding.
    B2 = 1280
    state2 = jax.random.normal(k_state2, (B2, STATE_DIM), dtype=jnp.float32)
    action2 = jax.random.normal(k_action2, (B2, ACTION_DIM), dtype=jnp.float32)
    q2 = jax.block_until_ready(parametric_dueling_q(state2, action2, params, tile_b=TILE_B))
    q2_ref = reference(state2, action2, params)
    assert q2.shape == (B2, 1), q2.shape
    assert jnp.allclose(q2, q2_ref, atol=1e-4, rtol=1e-4)

    print("KERNEL_OK")
</pallas_src>

<mosaic_0001>
module attributes {stable_mosaic.version = 11 : i64} {
  func.func @_dueling_kernel(%arg0: i32, %arg1: memref<8x512xf32, #tpu.memory_space<vmem>>, %arg2: memref<4x512xf32, #tpu.memory_space<vmem>>, %arg3: memref<16x8xf32, #tpu.memory_space<vmem>>, %arg4: memref<16x1xf32, #tpu.memory_space<vmem>>, %arg5: memref<8x16xf32, #tpu.memory_space<vmem>>, %arg6: memref<8x1xf32, #tpu.memory_space<vmem>>, %arg7: memref<1x8xf32, #tpu.memory_space<vmem>>, %arg8: memref<1x4xf32, #tpu.memory_space<vmem>>, %arg9: memref<1x1xf32, #tpu.memory_space<vmem>>, %arg10: memref<1x512xf32, #tpu.memory_space<vmem>>) attributes {dimension_semantics = [#tpu.dimension_semantics<parallel>], iteration_bounds = array<i64: 1>, scalar_prefetch = 0 : i64, scratch_operands = 0 : i64, tpu.core_type = #tpu.core_type<tc>, window_params = [{transform_indices = @transform_0, window_bounds = array<i64: 8, 512>}, {transform_indices = @transform_1, window_bounds = array<i64: 4, 512>}, {pipeline_mode = #tpu.pipeline_mode<synchronous>, transform_indices = @transform_2, window_bounds = array<i64: 16, 8>}, {pipeline_mode = #tpu.pipeline_mode<synchronous>, transform_indices = @transform_3, window_bounds = array<i64: 16, 1>}, {pipeline_mode = #tpu.pipeline_mode<synchronous>, transform_indices = @transform_4, window_bounds = array<i64: 8, 16>}, {pipeline_mode = #tpu.pipeline_mode<synchronous>, transform_indices = @transform_5, window_bounds = array<i64: 8, 1>}, {pipeline_mode = #tpu.pipeline_mode<synchronous>, transform_indices = @transform_6, window_bounds = array<i64: 1, 8>}, {pipeline_mode = #tpu.pipeline_mode<synchronous>, transform_indices = @transform_7, window_bounds = array<i64: 1, 4>}, {pipeline_mode = #tpu.pipeline_mode<synchronous>, transform_indices = @transform_8, window_bounds = array<i64: 1, 1>}, {transform_indices = @transform_9, window_bounds = array<i64: 1, 512>}]} {
    %c0 = arith.constant 0 : index
    %c0_0 = arith.constant 0 : index
    %0 = vector.load %arg1[%c0, %c0_0] : memref<8x512xf32, #tpu.memory_space<vmem>>, vector<8x512xf32>
    %c0_1 = arith.constant 0 : index
    %c0_2 = arith.constant 0 : index
    %1 = vector.load %arg2[%c0_1, %c0_2] : memref<4x512xf32, #tpu.memory_space<vmem>>, vector<4x512xf32>
    %c0_3 = arith.constant 0 : index
    %c0_4 = arith.constant 0 : index
    %2 = vector.load %arg3[%c0_3, %c0_4] : memref<16x8xf32, #tpu.memory_space<vmem>>, vector<16x8xf32>
    %cst = arith.constant dense<0.000000e+00> : vector<16x512xf32>
    %3 = tpu.matmul %2, %0, %cst {dimension_numbers = #tpu.dot_dimension_numbers<[1], [0], [0], [1], [0, 0, 1, 1], [], []>} : vector<16x8xf32>, vector<8x512xf32>, vector<16x512xf32> -> vector<16x512xf32>
    %c0_5 = arith.constant 0 : index
    %c0_6 = arith.constant 0 : index
    %4 = vector.load %arg4[%c0_5, %c0_6] : memref<16x1xf32, #tpu.memory_space<vmem>>, vector<16x1xf32>
    %5 = vector.broadcast %4 : vector<16x1xf32> to vector<16x512xf32>
    %6 = arith.addf %3, %5 : vector<16x512xf32>
    %cst_7 = arith.constant 0.000000e+00 : f32
    %7 = vector.broadcast %cst_7 : f32 to vector<16x512xf32>
    %8 = arith.maximumf %6, %7 : vector<16x512xf32>
    %c0_8 = arith.constant 0 : index
    %c0_9 = arith.constant 0 : index
    %9 = vector.load %arg5[%c0_8, %c0_9] : memref<8x16xf32, #tpu.memory_space<vmem>>, vector<8x16xf32>
    %cst_10 = arith.constant dense<0.000000e+00> : vector<8x512xf32>
    %10 = tpu.matmul %9, %8, %cst_10 {dimension_numbers = #tpu.dot_dimension_numbers<[1], [0], [0], [1], [0, 0, 1, 1], [], []>} : vector<8x16xf32>, vector<16x512xf32>, vector<8x512xf32> -> vector<8x512xf32>
    %c0_11 = arith.constant 0 : index
    %c0_12 = arith.constant 0 : index
    %11 = vector.load %arg6[%c0_11, %c0_12] : memref<8x1xf32, #tpu.memory_space<vmem>>, vector<8x1xf32>
    %12 = vector.broadcast %11 : vector<8x1xf32> to vector<8x512xf32>
    %13 = arith.addf %10, %12 : vector<8x512xf32>
    %cst_13 = arith.constant 0.000000e+00 : f32
    %14 = vector.broadcast %cst_13 : f32 to vector<8x512xf32>
    %15 = arith.maximumf %13, %14 : vector<8x512xf32>
    %c0_14 = arith.constant 0 : index
    %c0_15 = arith.constant 0 : index
    %16 = vector.load %arg7[%c0_14, %c0_15] : memref<1x8xf32, #tpu.memory_space<vmem>>, vector<1x8xf32>
    %cst_16 = arith.constant dense<0.000000e+00> : vector<1x512xf32>
    %17 = tpu.matmul %16, %15, %cst_16 {dimension_numbers = #tpu.dot_dimension_numbers<[1], [0], [0], [1], [0, 0, 1, 1], [], []>} : vector<1x8xf32>, vector<8x512xf32>, vector<1x512xf32> -> vector<1x512xf32>
    %c0_17 = arith.constant 0 : index
    %c0_18 = arith.constant 0 : index
    %18 = vector.load %arg8[%c0_17, %c0_18] : memref<1x4xf32, #tpu.memory_space<vmem>>, vector<1x4xf32>
    %cst_19 = arith.constant dense<0.000000e+00> : vector<1x512xf32>
    %19 = tpu.matmul %18, %1, %cst_19 {dimension_numbers = #tpu.dot_dimension_numbers<[1], [0], [0], [1], [0, 0, 1, 1], [], []>} : vector<1x4xf32>, vector<4x512xf32>, vector<1x512xf32> -> vector<1x512xf32>
    %20 = arith.addf %17, %19 : vector<1x512xf32>
    %c0_20 = arith.constant 0 : index
    %c0_21 = arith.constant 0 : index
    %21 = vector.load %arg9[%c0_20, %c0_21] : memref<1x1xf32, #tpu.memory_space<vmem>>, vector<1x1xf32>
    %22 = vector.broadcast %21 : vector<1x1xf32> to vector<1x512xf32>
    %23 = arith.addf %20, %22 : vector<1x512xf32>
    %c0_22 = arith.constant 0 : index
    %c0_23 = arith.constant 0 : index
    %24 = vector.load %arg10[%c0_22, %c0_23] : memref<1x512xf32, #tpu.memory_space<vmem>>, vector<1x512xf32>
    tpu.vector_store %arg10[%c0_22, %c0_23], %23 {strides = array<i32>} : memref<1x512xf32, #tpu.memory_space<vmem>>, vector<1x512xf32>,
    return
  }
  func.func @transform_0(%arg0: i32) -> (i32, i32) {
    %c0_i32 = arith.constant 0 : i32
    %c0_i32_0 = arith.constant 0 : i32
    return %c0_i32, %arg0 : i32, i32
  }
  func.func @transform_1(%arg0: i32) -> (i32, i32) {
    %c0_i32 = arith.constant 0 : i32
    %c0_i32_0 = arith.constant 0 : i32
    return %c0_i32, %arg0 : i32, i32
  }
  func.func @transform_2(%arg0: i32) -> (i32, i32) {
    %c0_i32 = arith.constant 0 : i32
    %c0_i32_0 = arith.constant 0 : i32
    %c0_i32_1 = arith.constant 0 : i32
    return %c0_i32, %c0_i32_0 : i32, i32
  }
  func.func @transform_3(%arg0: i32) -> (i32, i32) {
    %c0_i32 = arith.constant 0 : i32
    %c0_i32_0 = arith.constant 0 : i32
    %c0_i32_1 = arith.constant 0 : i32
    return %c0_i32, %c0_i32_0 : i32, i32
  }
  func.func @transform_4(%arg0: i32) -> (i32, i32) {
    %c0_i32 = arith.constant 0 : i32
    %c0_i32_0 = arith.constant 0 : i32
    %c0_i32_1 = arith.constant 0 : i32
    return %c0_i32, %c0_i32_0 : i32, i32
  }
  func.func @transform_5(%arg0: i32) -> (i32, i32) {
    %c0_i32 = arith.constant 0 : i32
    %c0_i32_0 = arith.constant 0 : i32
    %c0_i32_1 = arith.constant 0 : i32
    return %c0_i32, %c0_i32_0 : i32, i32
  }
  func.func @transform_6(%arg0: i32) -> (i32, i32) {
    %c0_i32 = arith.constant 0 : i32
    %c0_i32_0 = arith.constant 0 : i32
    %c0_i32_1 = arith.constant 0 : i32
    return %c0_i32, %c0_i32_0 : i32, i32
  }
  func.func @transform_7(%arg0: i32) -> (i32, i32) {
    %c0_i32 = arith.constant 0 : i32
    %c0_i32_0 = arith.constant 0 : i32
    %c0_i32_1 = arith.constant 0 : i32
    return %c0_i32, %c0_i32_0 : i32, i32
  }
  func.func @transform_8(%arg0: i32) -> (i32, i32) {
    %c0_i32 = arith.constant 0 : i32
    %c0_i32_0 = arith.constant 0 : i32
    %c0_i32_1 = arith.constant 0 : i32
    return %c0_i32, %c0_i32_0 : i32, i32
  }
  func.func @transform_9(%arg0: i32) -> (i32, i32) {
    %c0_i32 = arith.constant 0 : i32
    %c0_i32_0 = arith.constant 0 : i32
    return %c0_i32, %arg0 : i32, i32
  }
}

</mosaic_0001>

<bundles_post_ra>
// kernel: tpu_custom_call.1
= control target key start
LH: loop header
LB: loop body
LE: loop exit
PB: predicated region body
PF: predicated region fallthrough
CT: control target
= control target key end

     0   :  { %s934_s0 = inlined_call_operand.vmem [shape: f32[8,512], index: 0, kind: input, shape index: {}]   ;;  %s935_s1 = inlined_call_operand.vmem [shape: f32[4,512], index: 1, kind: input, shape index: {}]   ;;  %s936_s2 = inlined_call_operand.vmem [shape: f32[16,8], index: 2, kind: input, shape index: {}]   ;;  %s937_s3 = inlined_call_operand.vmem [shape: f32[16,1], index: 3, kind: input, shape index: {}]   ;;  %s938_s4 = inlined_call_operand.vmem [shape: f32[8,16], index: 4, kind: input, shape index: {}]   ;;  %s939_s5 = inlined_call_operand.vmem [shape: f32[8,1], index: 5, kind: input, shape index: {}]   ;;  %s940_s6 = inlined_call_operand.vmem [shape: f32[1,8], index: 6, kind: input, shape index: {}]   ;;  %s941_s7 = inlined_call_operand.vmem [shape: f32[1,4], index: 7, kind: input, shape index: {}]   ;;  %s942_s8 = inlined_call_operand.<no memory space> [shape: f32[1,1], index: 8, kind: input, shape index: {}]   ;;  %s943_s9 = inlined_call_operand.hbm [shape: f32[1,512], index: 9, kind: output, shape index: {}]  }
   0x1   :  { %v14_v0 = vstv %s942_s8 }
   0x2   :  { %15 = vst [vmem:[#allocation2] sm:$0x1] %v14_v0 }
   0x3   :  { %v36_v1 = vld [vmem:[%s934_s0 + $0x8] sm:$0xff]  ;;  %v38_v2 = vld [vmem:[%s934_s0 + $0x18] sm:$0xff]  ;;  %v35_v3 = vld [vmem:[%s934_s0] sm:$0xff]  ;;  %vm55_vm0 = vcmask 64512   ;;  %v807_v6 = vmov 0.0  }
   0x4   :  { %62 = vmatprep.subr.mxu0 %v36_v1  ;;  %139 = vmatprep.subr.mxu1 %v38_v2  ;;  %v37_v4 = vld [vmem:[%s934_s0 + $0x10] sm:$0xff]  ;;  %v41_v5 = vld [vmem:[%s936_s2] sm:$0xff] }
   0x5   :  { %63 = vmatpush1.msra.mxu0 %v35_v3  ;;  %126 = vmatprep.mubr.f32.mxu0 %v807_v6 }
   0x6   :  { %16 = vsyncpa [#allocation4], 0  ;;  %140 = vmatpush1.msra.mxu1 %v37_v4  ;;  %203 = vmatprep.mubr.f32.mxu1 %v807_v6  ;;  %v43_v7 = vld [vmem:[%s937_s3] sm:$0xff]  ;;  %v42_v8 = vld [vmem:[%s936_s2 + $0x8] sm:$0xff]  ;;  %v808_v9 = vmov 0   ;;  %vm391_vm1 = vcmask 1043456   ;;  %v693_v63 = vlaneseq }
   0x7   :  { %749 = vmatmul.mubr.msk.f32.vlgmr.msra.gmra.mrb[0].mxu0 %vm55_vm0, %v41_v5  ;;  %751 = vmatmul.mubr.msk.f32.vlgmr.msra.gmra.mrb[0].mxu1 %vm55_vm0, %v41_v5  ;;  %v44_v10 = vld [vmem:[%s937_s3 + $0x8] sm:$0xff]  ;;  %v225_v11 = vld [vmem:[%s939_s5] sm:$0xff]  ;;  %vm231_vm2 = vcmask 130048   ;;  %vm387_vm3 = vcmask 31744   ;;  %v809_v1 = vmov 1966171168  }
   0x8   :  { %132 = vmatprep.mubr.f32.mxu0 %v807_v6  ;;  %209 = vmatprep.mubr.f32.mxu1 %v807_v6  ;;  %v39_v35 = vld [vmem:[%s935_s1] sm:$0xff]  ;;  %v40_v36 = vld [vmem:[%s935_s1 + $0x8] sm:$0xff]  ;;  %v694_v0 = vshrl.u32 %v693_v63, 7  ;;  %v708_v2 = vunpack.c.l.s4 %v809_v1  ;;  %vm732_vm4 = vcmp.lt.s32.totalorder %v693_v63, 512 }
   0x9   :  { %779 = vset.pattern.permute.xlu0 %v808_v9  ;;  %780 = vset.pattern.permute.xlu1 %v808_v9  ;;  %v687_v12 = vld [vmem:[#allocation2] sm:$0x1]  ;;  %v385_v45 = vcombine.high %v39_v35, %v39_v35  ;;  %v386_v46 = vcombine.high %v40_v36, %v40_v36 }
   0xa   :  { %47 = vperm.xlu0 %779, %v43_v7   ;;  %228 = vperm.xlu1 %780, %v225_v11   ;;  %v224_v47 = vld [vmem:[%s938_s4] sm:$0xff]  ;;  %v695_v3 = vsub.s32 0, %v694_v0  ;;  %v709_v5 = vunpack.c.0.s8 %v708_v2 }
   0xb   :  { %750 = vmatmul.mubr.msk.f32.gmra.mrb[2].mxu0 %vm55_vm0, %v42_v8  ;;  %752 = vmatmul.mubr.msk.f32.gmra.mrb[2].mxu1 %vm55_vm0, %v42_v8  ;;  %v382_v48 = vld [vmem:[%s941_s7] sm:$0x1] }
   0xc   :  { %299 = vmatprep.mubr.f32.mxu0 %v807_v6  ;;  %370 = vmatprep.mubr.f32.mxu1 %v807_v6  ;;  %v381_v62 = vld [vmem:[%s940_s6] sm:$0x1]  ;;  %s810_s6 = smov [#allocation3]  }
   0xd   :  { %s741_s10 = sshll.u32 %s810_s6, 4  ;;  %s742_s10 = int_to_ptr.vmem [resolvable:$true] %s741_s10 }
   0xe   :  { %52 = vperm.xlu0 %779, %v44_v10   ;;  %690 = vperm.xlu1 %780, %v687_v12   ;;  %s783_s11 = scalar_lea.vmem %s742_s10, 64  ;;  %p788_p1 = scmp.lt.s32.totalorder %s742_s10, %s742_s10 }
   0xf   :  { %p784_p0 = scmp.ne.s32.totalorder %s742_s10, %s783_s11  ;;  %p789_p2 = scmp.lt.s32.totalorder %s783_s11, %s783_s11 }
  0x11   :  { %p790_p3 = por %p789_p2, %p788_p1 }
  0x13   :  { %p791_p4 = pnand %p790_p3, %p784_p0 }
  0x89   :  { %v48_v13 = vpop.permute.xlu0 %47  ;;  %v229_v49 = vpop.permute.xlu1 %228 }
  0x8d   :  { %v53_v20 = vpop.permute.xlu0 %52  ;;  %v691_v4 = vpop.permute.xlu1 %690 }
  0xda   :  { %v128_v14 = vpop.f32.mrb[0].mxu0  ;;  %v205_v15 = vpop.f32.mrb[0].mxu1 }
  0xdb   :  { %v130_v16 = vpop.f32.mrb[1].mxu0  ;;  %v207_v17 = vpop.f32.mrb[1].mxu1  ;;  %v129_v18 = vadd.f32 %v128_v14, %v48_v13  ;;  %v206_v19 = vadd.f32 %v205_v15, %v48_v13 }
  0xdc   :  { %v131_v21 = vadd.f32 %v130_v16, %v48_v13  ;;  %v208_v22 = vadd.f32 %v207_v17, %v48_v13  ;;  %v712_v13 = vsub.s32 %v709_v5, %v694_v0 }
  0xdd   :  { %v216_v31 = vmax.f32 %v129_v18, 0.0  ;;  %v218_v32 = vmax.f32 %v206_v19, 0.0 }
  0xde   :  { %v134_v23 = vpop.f32.mrb[2].mxu0  ;;  %v211_v24 = vpop.f32.mrb[2].mxu1  ;;  %v217_v37 = vmax.f32 %v131_v21, 0.0  ;;  %v219_v38 = vmax.f32 %v208_v22, 0.0 }
  0xdf   :  { %v135_v25 = vadd.f32 %v134_v23, %v53_v20  ;;  %v212_v26 = vadd.f32 %v211_v24, %v53_v20  ;;  %v136_v27 = vpop.f32.mrb[3].mxu0  ;;  %v213_v28 = vpop.f32.mrb[3].mxu1 }
  0xe0   :  { %v137_v29 = vadd.f32 %v136_v27, %v53_v20  ;;  %v214_v30 = vadd.f32 %v213_v28, %v53_v20 }
  0xe1   :  { %v220_v33 = vmax.f32 %v135_v25, 0.0  ;;  %v222_v34 = vmax.f32 %v212_v26, 0.0 }
  0xe2   :  { %v221_v39 = vmax.f32 %v137_v29, 0.0  ;;  %v223_v40 = vmax.f32 %v214_v30, 0.0 }
  0xe3   :  { %v765_v41 = vpack.c.bf16 %v220_v33, %v216_v31  ;;  %v769_v42 = vpack.c.bf16 %v222_v34, %v218_v32 }
  0xe4   :  { %v763_v43 = vpack.c.bf16 %v221_v39, %v217_v37  ;;  %v767_v44 = vpack.c.bf16 %v223_v40, %v219_v38 }
  0xe6   :  { %764 = vmatprep.subr.bf16.mxu0 %v763_v43  ;;  %768 = vmatprep.subr.bf16.mxu1 %v767_v44 }
  0xe7   :  { %766 = vmatpush1.bf16.msra.mxu0 %v765_v41  ;;  %770 = vmatpush1.bf16.msra.mxu1 %v769_v42 }
  0xe8   :  { %755 = vmatprep.subr.msk.mxu0 %vm391_vm1, %v385_v45  ;;  %758 = vmatprep.subr.msk.mxu1 %vm391_vm1, %v386_v46 }
  0xea   :  { %753 = vmatmul.mubr.msk.f32.vlgmr.msra.gmra.mrb[4].mxu0 %vm231_vm2, %v224_v47  ;;  %754 = vmatmul.mubr.msk.f32.vlgmr.msra.gmra.mrb[4].mxu1 %vm231_vm2, %v224_v47 }
  0xeb   :  { %756 = vmatpush1.msk.msra.mxu0 %vm391_vm1, %v39_v35  ;;  %464 = vmatprep.mubr.f32.mxu0 %v807_v6 }
  0xec   :  { %759 = vmatpush1.msk.msra.mxu1 %vm391_vm1, %v40_v36  ;;  %535 = vmatprep.mubr.f32.mxu1 %v807_v6 }
  0xee   :  { %757 = vmatmul.mubr.msk.f32.vlgmr.msra.gmra.mrb[6].mxu0 %vm387_vm3, %v382_v48  ;;  %760 = vmatmul.mubr.msk.f32.vlgmr.msra.gmra.mrb[6].mxu1 %vm387_vm3, %v382_v48 }
  0xef   :  { %609 = vmatprep.mubr.f32.mxu0 %v807_v6  ;;  %680 = vmatprep.mubr.f32.mxu1 %v807_v6  ;;  %v696_v6 = vrot.slane %v691_v4, %v695_v3 }
 0x1bd   :  { %v301_v50 = vpop.f32.mrb[4].mxu0  ;;  %v372_v51 = vpop.f32.mrb[4].mxu1 }
 0x1be   :  { %v302_v52 = vadd.f32 %v301_v50, %v229_v49  ;;  %v373_v53 = vadd.f32 %v372_v51, %v229_v49  ;;  %v303_v54 = vpop.f32.mrb[5].mxu0  ;;  %v374_v55 = vpop.f32.mrb[5].mxu1 }
 0x1bf   :  { %v304_v56 = vadd.f32 %v303_v54, %v229_v49  ;;  %v375_v57 = vadd.f32 %v374_v55, %v229_v49 }
 0x1c0   :  { %v377_v60 = vmax.f32 %v302_v52, 0.0  ;;  %v379_v61 = vmax.f32 %v373_v53, 0.0 }
 0x1c1   :  { %v378_v58 = vmax.f32 %v304_v56, 0.0  ;;  %v380_v59 = vmax.f32 %v375_v57, 0.0 }
 0x1c3   :  { %545 = vmatprep.subr.mxu0 %v378_v58  ;;  %616 = vmatprep.subr.mxu1 %v380_v59 }
 0x1c4   :  { %546 = vmatpush1.msra.mxu0 %v377_v60  ;;  %617 = vmatpush1.msra.mxu1 %v379_v61 }
 0x1c5   :  { %761 = vmatmul.mubr.msk.f32.vlgmr.msra.gmra.mrb[6].mxu0 %vm55_vm0, %v381_v62  ;;  %762 = vmatmul.mubr.msk.f32.vlgmr.msra.gmra.mrb[6].mxu1 %vm55_vm0, %v381_v62 }
 0x298   :  { %v611_v7 = vpop.f32.mrb[6].mxu0  ;;  %v682_v8 = vpop.f32.mrb[6].mxu1 }
 0x299   :  { %v697_v9 = vadd.f32 %v696_v6, %v611_v7  ;;  %v699_v10 = vadd.f32 %v696_v6, %v682_v8  ;;  %v613_v11 = vpop.f32.mrb[7].mxu0  ;;  %v684_v12 = vpop.f32.mrb[7].mxu1 }
 0x29a   :  { %v698_v14 = vadd.f32 %v696_v6, %v613_v11  ;;  %v700_v15 = vadd.f32 %v696_v6, %v684_v12 }
 0x29c   :  { %v705_v16 = vcombine.low %v697_v9, %v698_v14  ;;  %v706_v17 = vcombine.low %v699_v10, %v700_v15 }
 0x29e   :  { %v713_v18 = vrot.slane %v705_v16, %v712_v13  ;;  %v720_v19 = vrot.slane %v706_v17, %v712_v13 }
 0x2a0   :  { %v721_v20 = vcombine.low %v713_v18, %v720_v19 }
 0x2a2   :  { %v728_v21 = vrot.slane %v721_v20, %v712_v13 }
 0x2a4   :  { %734 = vst.msk [vmem:[#allocation3] sm:$0xf] %vm732_vm4, %v728_v21 }
 0x2a5   :  { %794 = shalt.err (!%p791_p4)
}
 0x2a6   :  { %s795_s14 = scalar_lea.hbm %s943_s9, 64 }
 0x2a7   :  { %p796_p5 = scmp.ne.s32.totalorder %s943_s9, %s795_s14  ;;  %p799_p6 = scmp.lt.u32.totalorder %s795_s14, %s943_s9 }
 0x2a9   :  { %p801_p7 = pnand %p799_p6, %p796_p5 }
 0x2ab   :  { %804 = shalt.err (!%p801_p7)
}
 0x2ac   :  { %744 = dma.vmem_to_hbm [thread:$0]  %s742_s10, 64, %s943_s9, [#allocation4]  }
 0x2ad   :  { %805 = dma.done.wait [#allocation4], 64  }
 0x2ae   :  { %806 = vsyncadd [#allocation4], 4294967232 }
 0x2af   :  { %748 = vsyncpa [#allocation4], 1 }

</bundles_post_ra>
